<compile_context>
chip_gen: v5e
topology: v5e:2x2
jax: 0.10.0
libtpu: 0.0.40
codegen_flags: <defaults>
</compile_context>

<pallas_src>
import functools

import jax
import jax.numpy as jnp
from jax.experimental import pallas as pl
from jax.experimental.pallas import tpu as pltpu


_DEFAULT_VMEM_BUDGET = 20 * 1024 * 1024  # bytes of double-buffered pipeline buffers


def _round_up(x, m):
    return -(-x // m) * m


def _history_scorer_kernel(scal_ref, wds_ref, wdc_ref, sts_ref, stc_ref, out_ref,
                           *, approx_reciprocal):
    """Elementwise history scorer on one (tb, tl) tile.

    scal_ref : SMEM (4,) f32 -> [cur_wd_sin, cur_wd_cos, cur_st_sin, cur_st_cos]
    wds/wdc/sts/stc_ref : VMEM (tb, tl_in) f32   (tl_in >= tl_out)
    out_ref  : VMEM (C, tb, tl_out)  channel-major, lane-dense, C in {4, 6}
    """
    lc = out_ref.shape[-1]  # static output block width (== input width on tiled path)

    def score(ref, cur):
        d = jnp.abs(ref[:, :lc] - cur) + 0.001
        if approx_reciprocal:
            # EUP slot; essentially free filler on this bandwidth-bound kernel,
            # but breaks exact-divide bit parity -- opt in only.
            return pl.reciprocal(d, approx=True)
        return 1.0 / d

    wd_sin = score(wds_ref, scal_ref[0])
    wd_cos = score(wdc_ref, scal_ref[1])
    st_sin = score(sts_ref, scal_ref[2])
    st_cos = score(stc_ref, scal_ref[3])

    dt = out_ref.dtype
    if out_ref.shape[0] == 6:
        # torch.cat((wd_sin, wd_cos, wd_sin, wd_cos, st_sin, st_cos), dim=2)
        out_ref[0] = wd_sin.astype(dt)
        out_ref[1] = wd_cos.astype(dt)
        out_ref[2] = wd_sin.astype(dt)
        out_ref[3] = wd_cos.astype(dt)
        out_ref[4] = st_sin.astype(dt)
        out_ref[5] = st_cos.astype(dt)
    else:
        # Deduplicated interface: consumer indexes channels [0, 1, 0, 1, 2, 3].
        out_ref[0] = wd_sin.astype(dt)
        out_ref[1] = wd_cos.astype(dt)
        out_ref[2] = st_sin.astype(dt)
        out_ref[3] = st_cos.astype(dt)


def _pick_tiles(B, L, Lc, n_out_ch, out_itemsize, budget):
    """Pick a VMEM-budgeted tiling.

    Returns (mode, tb, tl_in, tl_out, grid):
      mode == "rows" : full-length rows, grid over batch only
                       (input block (tb, L), output block (C, tb, Lc); both
                        widths equal the full array dims, so no 128-alignment
                        is needed and each input DMA is one contiguous run).
      mode == "tiles": ragged 2-D grid with 128-aligned length tiles (the last
                       block along either axis may be partial; Pallas pads the
                       reads and drops out-of-bounds writes, which is safe for
                       this elementwise formula).
    """
    in_itemsize = 4  # f32 inputs

    def step_bytes(tb, tl_in, tl_out):
        # 4 input blocks + C output channels, x2 for pipeline double-buffering.
        return 2 * tb * (4 * tl_in * in_itemsize + n_out_ch * tl_out * out_itemsize)

    tb_min = B if B < 8 else 8

    # --- Preferred: full-length rows (grid over batch only). ---
    if step_bytes(tb_min, L, Lc) <= budget:
        if B < 8:
            tb = B
        else:
            per_row = 2 * (4 * L * in_itemsize + n_out_ch * Lc * out_itemsize)
            tb = (budget // per_row) // 8 * 8
            tb = max(8, min(tb, _round_up(B, 8), 512))
            # v7x has 2 TensorCores: keep >= 2 parallel grid steps when possible.
            if B > 8 and pl.cdiv(B, tb) < 2:
                tb = _round_up(pl.cdiv(B, 2), 8)
        return "rows", tb, L, Lc, (pl.cdiv(B, tb),)

    # --- Fallback: ragged 2-D grid, 128-aligned length tiles. ---
    tl = min(_round_up(Lc, 128), 2048)
    while tl > 128 and step_bytes(tb_min, tl, tl) > budget:
        tl -= 128
    if B < 8:
        tb = B
    else:
        per_row = 2 * tl * (4 * in_itemsize + n_out_ch * out_itemsize)
        tb = (budget // per_row) // 8 * 8
        tb = max(8, min(tb, _round_up(B, 8), 512))
    return "tiles", tb, tl, tl, (pl.cdiv(B, tb), pl.cdiv(Lc, tl))


def _call_pallas(scalars, wds, wdc, sts, stc, Lc, n_out_ch, out_dtype,
                 approx_reciprocal, budget):
    B, L = wds.shape
    mode, tb, tl_in, tl_out, grid = _pick_tiles(
        B, L, Lc, n_out_ch, jnp.dtype(out_dtype).itemsize, budget)

    kernel = functools.partial(_history_scorer_kernel,
                               approx_reciprocal=approx_reciprocal)

    if mode == "rows":
        in_spec = pl.BlockSpec((tb, tl_in), lambda i: (i, 0))
        out_spec = pl.BlockSpec((n_out_ch, tb, tl_out), lambda i: (0, i, 0))
        dims = ("parallel",)
    else:
        in_spec = pl.BlockSpec((tb, tl_in), lambda i, j: (i, j))
        out_spec = pl.BlockSpec((n_out_ch, tb, tl_out), lambda i, j: (0, i, j))
        dims = ("parallel", "parallel")

    # Raise the scoped-VMEM limit above v5e's 16 MiB default; 32 MiB also fits
    # v7x's 64 MiB physical VMEM with headroom.  Grows with a user budget.
    vmem_limit = max(32 * 1024 * 1024, budget + 8 * 1024 * 1024)

    return pl.pallas_call(
        kernel,
        out_shape=jax.ShapeDtypeStruct((n_out_ch, B, Lc), out_dtype),
        grid=grid,
        in_specs=[
            pl.BlockSpec(memory_space=pltpu.MemorySpace.SMEM),  # current scalars
            in_spec, in_spec, in_spec, in_spec,
        ],
        out_specs=out_spec,
        compiler_params=pltpu.CompilerParams(
            dimension_semantics=dims,
            vmem_limit_bytes=vmem_limit),
    )(scalars, wds, wdc, sts, stc)


def _history_scorer_xla(scalars, wds, wdc, sts, stc, Lc, n_out_ch, out_dtype):
    """Pure-XLA fallback (channel-major output) for tiny problem sizes."""
    wd_sin = 1.0 / (jnp.abs(wds[:, :Lc] - scalars[0]) + 0.001)
    wd_cos = 1.0 / (jnp.abs(wdc[:, :Lc] - scalars[1]) + 0.001)
    st_sin = 1.0 / (jnp.abs(sts[:, :Lc] - scalars[2]) + 0.001)
    st_cos = 1.0 / (jnp.abs(stc[:, :Lc] - scalars[3]) + 0.001)
    if n_out_ch == 6:
        chans = [wd_sin, wd_cos, wd_sin, wd_cos, st_sin, st_cos]
    else:
        chans = [wd_sin, wd_cos, st_sin, st_cos]
    return jnp.stack(chans, axis=0).astype(out_dtype)


def history_scorer(history, traj, cp_lens, *, layout="channel_major",
                   dedup_channels=False, out_dtype=jnp.float32,
                   approx_reciprocal=False, use_pallas=None,
                   vmem_budget_bytes=_DEFAULT_VMEM_BUDGET):
    """Pallas implementation of History_Scorer.forward.

    history: dict with 'history_weekday_sin/cos', 'history_start_time_sin/cos',
             each of shape (B, L) float32.
    traj:    dict with 'weekday_s/c', 'start_time_s/c', each at least (1, 1).
    layout:  "channel_major" (default, lane-dense (C, B, Lc), no transpose) or
             "torch" ((B, Lc, 6), exact PyTorch torch.cat(..., dim=2) layout).
    dedup_channels: emit 4 channels instead of 6 (consumer indexes
             [0,1,0,1,2,3]); only with layout="channel_major".
    out_dtype: jnp.float32 (default) or jnp.bfloat16 to halve store traffic.
    approx_reciprocal: use the EUP approximate reciprocal (loses exact-divide
             bit parity with the PyTorch reference).
    use_pallas: True/False to force, None to auto-gate on problem size.
    vmem_budget_bytes: pipeline-buffer budget; raise on v5e/v6e (128 MiB VMEM)
             for even larger tiles, keep <= ~24 MiB on v7x.
    """
    if layout not in ("channel_major", "torch"):
        raise ValueError(f"unknown layout: {layout!r}")
    if layout == "torch" and dedup_channels:
        raise ValueError("dedup_channels requires layout='channel_major'")

    # "Current" scalars (PyTorch: .cpu().numpy()[0][0]) -- kept on device, SMEM.
    scalars = jnp.stack(
        [
            traj["weekday_s"][0, 0],
            traj["weekday_c"][0, 0],
            traj["start_time_s"][0, 0],
            traj["start_time_c"][0, 0],
        ]
    ).astype(jnp.float32)

    # Full (B, L) arrays -- no wrapper-side slicing; the [:, :-cp_lens] slice is
    # absorbed into the block indexing / a static in-kernel slice.
    wds = history["history_weekday_sin"].astype(jnp.float32)
    wdc = history["history_weekday_cos"].astype(jnp.float32)
    sts = history["history_start_time_sin"].astype(jnp.float32)
    stc = history["history_start_time_cos"].astype(jnp.float32)

    B, L = wds.shape
    Lc = L - cp_lens
    assert Lc > 0, "cp_lens must be smaller than the history length"
    n_out_ch = 4 if dedup_channels else 6

    if use_pallas is None:
        use_pallas = (B * Lc) >= 65536  # below this, dispatch overhead dominates

    if use_pallas:
        out_cm = _call_pallas(scalars, wds, wdc, sts, stc, Lc, n_out_ch,
                              out_dtype, approx_reciprocal, vmem_budget_bytes)
    else:
        out_cm = _history_scorer_xla(scalars, wds, wdc, sts, stc, Lc,
                                     n_out_ch, out_dtype)

    if layout == "channel_major":
        # Preferred lane-dense layout: avoids a lane-width-6 transpose that
        # costs more HBM traffic than the kernel itself.
        return out_cm
    # PyTorch-compatible layout (B, Lc, 6) == torch.cat(..., dim=2).
    return jnp.transpose(out_cm, (1, 2, 0))


# ----------------------------- reference & demo -----------------------------

def _reference(history, traj, cp_lens):
    cw_s = traj["weekday_s"][0, 0]
    cw_c = traj["weekday_c"][0, 0]
    ct_s = traj["start_time_s"][0, 0]
    ct_c = traj["start_time_c"][0, 0]
    wds = 1.0 / (jnp.abs(history["history_weekday_sin"][:, :-cp_lens, None] - cw_s) + 0.001)
    wdc = 1.0 / (jnp.abs(history["history_weekday_cos"][:, :-cp_lens, None] - cw_c) + 0.001)
    sts = 1.0 / (jnp.abs(history["history_start_time_sin"][:, :-cp_lens, None] - ct_s) + 0.001)
    stc = 1.0 / (jnp.abs(history["history_start_time_cos"][:, :-cp_lens, None] - ct_c) + 0.001)
    return jnp.concatenate((wds, wdc, wds, wdc, sts, stc), axis=2)


def _make_inputs(key, B, L):
    ks = jax.random.split(key, 8)
    history = {
        "history_weekday_sin": jax.random.uniform(ks[0], (B, L), jnp.float32, -1.0, 1.0),
        "history_weekday_cos": jax.random.uniform(ks[1], (B, L), jnp.float32, -1.0, 1.0),
        "history_start_time_sin": jax.random.uniform(ks[2], (B, L), jnp.float32, -1.0, 1.0),
        "history_start_time_cos": jax.random.uniform(ks[3], (B, L), jnp.float32, -1.0, 1.0),
    }
    traj = {
        "weekday_s": jax.random.uniform(ks[4], (1, 1), jnp.float32, -1.0, 1.0),
        "weekday_c": jax.random.uniform(ks[5], (1, 1), jnp.float32, -1.0, 1.0),
        "start_time_s": jax.random.uniform(ks[6], (1, 1), jnp.float32, -1.0, 1.0),
        "start_time_c": jax.random.uniform(ks[7], (1, 1), jnp.float32, -1.0, 1.0),
    }
    return history, traj


if __name__ == "__main__":
    k1, k2 = jax.random.split(jax.random.PRNGKey(0), 2)

    # Case 1: tiny shapes -> full-row path (grid over batch only).
    B, L, cp_lens = 2, 16, 4
    hist1, traj1 = _make_inputs(k1, B, L)
    ref1 = _reference(hist1, traj1, cp_lens)                      # (B, Lc, 6)

    out_torch = jax.block_until_ready(
        history_scorer(hist1, traj1, cp_lens, layout="torch", use_pallas=True))
    assert out_torch.shape == (B, L - cp_lens, 6), out_torch.shape
    assert jnp.allclose(out_torch, ref1, rtol=1e-5, atol=1e-5)

    out_cm = jax.block_until_ready(
        history_scorer(hist1, traj1, cp_lens, use_pallas=True))   # channel-major default
    assert out_cm.shape == (6, B, L - cp_lens), out_cm.shape
    assert jnp.allclose(jnp.transpose(out_cm, (1, 2, 0)), ref1, rtol=1e-5, atol=1e-5)

    # Case 2: ragged 2-D tiled path (forced via a tiny VMEM budget), with
    # non-multiple-of-8 batch and non-multiple-of-128 Lc (partial last blocks).
    B2, L2, cp2 = 12, 200, 8      # Lc = 192 -> grid (2, 2) with tb=8, tl=128
    hist2, traj2 = _make_inputs(k2, B2, L2)
    ref2 = _reference(hist2, traj2, cp2)
    out2 = jax.block_until_ready(
        history_scorer(hist2, traj2, cp2, use_pallas=True, vmem_budget_bytes=100_000))
    assert out2.shape == (6, B2, L2 - cp2), out2.shape
    assert jnp.allclose(jnp.transpose(out2, (1, 2, 0)), ref2, rtol=1e-5, atol=1e-5)

    # Case 3: byte-trimmed consumer interface (4 deduplicated channels, bf16).
    out3 = jax.block_until_ready(
        history_scorer(hist2, traj2, cp2, use_pallas=True, dedup_channels=True,
                       out_dtype=jnp.bfloat16, vmem_budget_bytes=100_000))
    assert out3.shape == (4, B2, L2 - cp2), out3.shape
    ref3 = jnp.transpose(ref2[:, :, jnp.array([0, 1, 4, 5])], (2, 0, 1))
    assert jnp.allclose(out3.astype(jnp.float32), ref3, rtol=2e-2, atol=1e-2)

    print("KERNEL_OK")
</pallas_src>

<mosaic_0001>
module attributes {stable_mosaic.version = 11 : i64} {
  func.func @_history_scorer_kernel(%arg0: i32, %arg1: memref<4xf32, #tpu.memory_space<smem>>, %arg2: memref<2x16xf32, #tpu.memory_space<vmem>>, %arg3: memref<2x16xf32, #tpu.memory_space<vmem>>, %arg4: memref<2x16xf32, #tpu.memory_space<vmem>>, %arg5: memref<2x16xf32, #tpu.memory_space<vmem>>, %arg6: memref<6x2x12xf32, #tpu.memory_space<vmem>>) attributes {dimension_semantics = [#tpu.dimension_semantics<parallel>], iteration_bounds = array<i64: 1>, scalar_prefetch = 0 : i64, scratch_operands = 0 : i64, tpu.core_type = #tpu.core_type<tc>, window_params = [{transform_indices = @transform_0, window_bounds = array<i64: 4>}, {transform_indices = @transform_1, window_bounds = array<i64: 2, 16>}, {transform_indices = @transform_2, window_bounds = array<i64: 2, 16>}, {transform_indices = @transform_3, window_bounds = array<i64: 2, 16>}, {transform_indices = @transform_4, window_bounds = array<i64: 2, 16>}, {transform_indices = @transform_5, window_bounds = array<i64: 6, 2, 12>}]} {
    %c0 = arith.constant 0 : index
    %0 = memref.load %arg1[%c0] : memref<4xf32, #tpu.memory_space<smem>>
    %c0_0 = arith.constant 0 : index
    %c0_1 = arith.constant 0 : index
    %1 = vector.load %arg2[%c0_0, %c0_1] : memref<2x16xf32, #tpu.memory_space<vmem>>, vector<2x12xf32>
    %2 = vector.broadcast %0 : f32 to vector<2x12xf32>
    %3 = arith.subf %1, %2 : vector<2x12xf32>
    %4 = math.absf %3 : vector<2x12xf32>
    %cst = arith.constant 1.000000e-03 : f32
    %5 = vector.broadcast %cst : f32 to vector<2x12xf32>
    %6 = arith.addf %4, %5 : vector<2x12xf32>
    %cst_2 = arith.constant 1.000000e+00 : f32
    %7 = vector.broadcast %cst_2 : f32 to vector<2x12xf32>
    %8 = arith.divf %7, %6 : vector<2x12xf32>
    %c1 = arith.constant 1 : index
    %9 = memref.load %arg1[%c1] : memref<4xf32, #tpu.memory_space<smem>>
    %c0_3 = arith.constant 0 : index
    %c0_4 = arith.constant 0 : index
    %10 = vector.load %arg3[%c0_3, %c0_4] : memref<2x16xf32, #tpu.memory_space<vmem>>, vector<2x12xf32>
    %11 = vector.broadcast %9 : f32 to vector<2x12xf32>
    %12 = arith.subf %10, %11 : vector<2x12xf32>
    %13 = math.absf %12 : vector<2x12xf32>
    %cst_5 = arith.constant 1.000000e-03 : f32
    %14 = vector.broadcast %cst_5 : f32 to vector<2x12xf32>
    %15 = arith.addf %13, %14 : vector<2x12xf32>
    %cst_6 = arith.constant 1.000000e+00 : f32
    %16 = vector.broadcast %cst_6 : f32 to vector<2x12xf32>
    %17 = arith.divf %16, %15 : vector<2x12xf32>
    %c2 = arith.constant 2 : index
    %18 = memref.load %arg1[%c2] : memref<4xf32, #tpu.memory_space<smem>>
    %c0_7 = arith.constant 0 : index
    %c0_8 = arith.constant 0 : index
    %19 = vector.load %arg4[%c0_7, %c0_8] : memref<2x16xf32, #tpu.memory_space<vmem>>, vector<2x12xf32>
    %20 = vector.broadcast %18 : f32 to vector<2x12xf32>
    %21 = arith.subf %19, %20 : vector<2x12xf32>
    %22 = math.absf %21 : vector<2x12xf32>
    %cst_9 = arith.constant 1.000000e-03 : f32
    %23 = vector.broadcast %cst_9 : f32 to vector<2x12xf32>
    %24 = arith.addf %22, %23 : vector<2x12xf32>
    %cst_10 = arith.constant 1.000000e+00 : f32
    %25 = vector.broadcast %cst_10 : f32 to vector<2x12xf32>
    %26 = arith.divf %25, %24 : vector<2x12xf32>
    %c3 = arith.constant 3 : index
    %27 = memref.load %arg1[%c3] : memref<4xf32, #tpu.memory_space<smem>>
    %c0_11 = arith.constant 0 : index
    %c0_12 = arith.constant 0 : index
    %28 = vector.load %arg5[%c0_11, %c0_12] : memref<2x16xf32, #tpu.memory_space<vmem>>, vector<2x12xf32>
    %29 = vector.broadcast %27 : f32 to vector<2x12xf32>
    %30 = arith.subf %28, %29 : vector<2x12xf32>
    %31 = math.absf %30 : vector<2x12xf32>
    %cst_13 = arith.constant 1.000000e-03 : f32
    %32 = vector.broadcast %cst_13 : f32 to vector<2x12xf32>
    %33 = arith.addf %31, %32 : vector<2x12xf32>
    %cst_14 = arith.constant 1.000000e+00 : f32
    %34 = vector.broadcast %cst_14 : f32 to vector<2x12xf32>
    %35 = arith.divf %34, %33 : vector<2x12xf32>
    %c0_15 = arith.constant 0 : index
    %c0_16 = arith.constant 0 : index
    %c0_17 = arith.constant 0 : index
    %36 = vector.load %arg6[%c0_15, %c0_16, %c0_17] : memref<6x2x12xf32, #tpu.memory_space<vmem>>, vector<1x2x12xf32>
    %37 = vector.shape_cast %36 : vector<1x2x12xf32> to vector<2x12xf32>
    %38 = vector.shape_cast %8 : vector<2x12xf32> to vector<1x2x12xf32>
    tpu.vector_store %arg6[%c0_15, %c0_16, %c0_17], %38 {strides = array<i32>} : memref<6x2x12xf32, #tpu.memory_space<vmem>>, vector<1x2x12xf32>,
    %c1_18 = arith.constant 1 : index
    %c0_19 = arith.constant 0 : index
    %c0_20 = arith.constant 0 : index
    %39 = vector.load %arg6[%c1_18, %c0_19, %c0_20] : memref<6x2x12xf32, #tpu.memory_space<vmem>>, vector<1x2x12xf32>
    %40 = vector.shape_cast %39 : vector<1x2x12xf32> to vector<2x12xf32>
    %41 = vector.shape_cast %17 : vector<2x12xf32> to vector<1x2x12xf32>
    tpu.vector_store %arg6[%c1_18, %c0_19, %c0_20], %41 {strides = array<i32>} : memref<6x2x12xf32, #tpu.memory_space<vmem>>, vector<1x2x12xf32>,
    %c2_21 = arith.constant 2 : index
    %c0_22 = arith.constant 0 : index
    %c0_23 = arith.constant 0 : index
    %42 = vector.load %arg6[%c2_21, %c0_22, %c0_23] : memref<6x2x12xf32, #tpu.memory_space<vmem>>, vector<1x2x12xf32>
    %43 = vector.shape_cast %42 : vector<1x2x12xf32> to vector<2x12xf32>
    %44 = vector.shape_cast %8 : vector<2x12xf32> to vector<1x2x12xf32>
    tpu.vector_store %arg6[%c2_21, %c0_22, %c0_23], %44 {strides = array<i32>} : memref<6x2x12xf32, #tpu.memory_space<vmem>>, vector<1x2x12xf32>,
    %c3_24 = arith.constant 3 : index
    %c0_25 = arith.constant 0 : index
    %c0_26 = arith.constant 0 : index
    %45 = vector.load %arg6[%c3_24, %c0_25, %c0_26] : memref<6x2x12xf32, #tpu.memory_space<vmem>>, vector<1x2x12xf32>
    %46 = vector.shape_cast %45 : vector<1x2x12xf32> to vector<2x12xf32>
    %47 = vector.shape_cast %17 : vector<2x12xf32> to vector<1x2x12xf32>
    tpu.vector_store %arg6[%c3_24, %c0_25, %c0_26], %47 {strides = array<i32>} : memref<6x2x12xf32, #tpu.memory_space<vmem>>, vector<1x2x12xf32>,
    %c4 = arith.constant 4 : index
    %c0_27 = arith.constant 0 : index
    %c0_28 = arith.constant 0 : index
    %48 = vector.load %arg6[%c4, %c0_27, %c0_28] : memref<6x2x12xf32, #tpu.memory_space<vmem>>, vector<1x2x12xf32>
    %49 = vector.shape_cast %48 : vector<1x2x12xf32> to vector<2x12xf32>
    %50 = vector.shape_cast %26 : vector<2x12xf32> to vector<1x2x12xf32>
    tpu.vector_store %arg6[%c4, %c0_27, %c0_28], %50 {strides = array<i32>} : memref<6x2x12xf32, #tpu.memory_space<vmem>>, vector<1x2x12xf32>,
    %c5 = arith.constant 5 : index
    %c0_29 = arith.constant 0 : index
    %c0_30 = arith.constant 0 : index
    %51 = vector.load %arg6[%c5, %c0_29, %c0_30] : memref<6x2x12xf32, #tpu.memory_space<vmem>>, vector<1x2x12xf32>
    %52 = vector.shape_cast %51 : vector<1x2x12xf32> to vector<2x12xf32>
    %53 = vector.shape_cast %35 : vector<2x12xf32> to vector<1x2x12xf32>
    tpu.vector_store %arg6[%c5, %c0_29, %c0_30], %53 {strides = array<i32>} : memref<6x2x12xf32, #tpu.memory_space<vmem>>, vector<1x2x12xf32>,
    return
  }
  func.func @transform_0(%arg0: i32) -> i32 {
    %c0_i32 = arith.constant 0 : i32
    %c0_i32_0 = arith.constant 0 : i32
    return %c0_i32 : i32
  }
  func.func @transform_1(%arg0: i32) -> (i32, i32) {
    %c0_i32 = arith.constant 0 : i32
    %c0_i32_0 = arith.constant 0 : i32
    return %arg0, %c0_i32 : i32, i32
  }
  func.func @transform_2(%arg0: i32) -> (i32, i32) {
    %c0_i32 = arith.constant 0 : i32
    %c0_i32_0 = arith.constant 0 : i32
    return %arg0, %c0_i32 : i32, i32
  }
  func.func @transform_3(%arg0: i32) -> (i32, i32) {
    %c0_i32 = arith.constant 0 : i32
    %c0_i32_0 = arith.constant 0 : i32
    return %arg0, %c0_i32 : i32, i32
  }
  func.func @transform_4(%arg0: i32) -> (i32, i32) {
    %c0_i32 = arith.constant 0 : i32
    %c0_i32_0 = arith.constant 0 : i32
    return %arg0, %c0_i32 : i32, i32
  }
  func.func @transform_5(%arg0: i32) -> (i32, i32, i32) {
    %c0_i32 = arith.constant 0 : i32
    %c0_i32_0 = arith.constant 0 : i32
    %c0_i32_1 = arith.constant 0 : i32
    return %c0_i32, %arg0, %c0_i32_0 : i32, i32, i32
  }
}

</mosaic_0001>

<bundles_post_ra>
// kernel: tpu_custom_call.1
= control target key start
LH: loop header
LB: loop body
LE: loop exit
PB: predicated region body
PF: predicated region fallthrough
CT: control target
= control target key end

     0   :  { %10 = vsyncpa [#allocation5], 0  ;;  %s422_s0 = inlined_call_operand.hbm [shape: f32[4], index: 0, kind: input, shape index: {}]   ;;  %s423_s1 = inlined_call_operand.hbm [shape: f32[2,16], index: 1, kind: input, shape index: {}]   ;;  %s424_s2 = inlined_call_operand.hbm [shape: f32[2,16], index: 2, kind: input, shape index: {}]   ;;  %s425_s3 = inlined_call_operand.vmem [shape: f32[2,16], index: 3, kind: input, shape index: {}]   ;;  %s426_s4 = inlined_call_operand.hbm [shape: f32[2,16], index: 4, kind: input, shape index: {}]   ;;  %s427_s5 = inlined_call_operand.hbm [shape: f32[6,2,12], index: 5, kind: output, shape index: {}]  }
   0x1   :  { %11 = vsyncpa [#allocation3], 0 }
   0x2   :  { %12 = vsyncpa [#allocation8], 0  ;;  %s39_s20 = sshll.u32 %s424_s2, 4  ;;  %s40_s20 = int_to_ptr.hbm [resolvable:$true] %s39_s20 }
   0x3   :  { %13 = vsyncpa [#allocation4], 0  ;;  %s326_s21 = smov [#allocation7]   ;;  %s19_s25 = sshll.u32 %s422_s0, 4  ;;  %s20_s25 = int_to_ptr.hbm [resolvable:$true] %s19_s25 }
   0x4   :  { %s41_s22 = sshll.u32 %s326_s21, 4  ;;  %s327_s26 = smov [#allocation2]   ;;  %s42_s22 = int_to_ptr.vmem [resolvable:$true] %s41_s22 }
   0x5   :  { %44 = dma.hbm_to_vmem [thread:$0]  %s40_s20, 32, %s42_s22, [#allocation8]  }
   0x6   :  { %22 = dma.hbm_to_smem %s20_s25, 16, %s327_s26, [#allocation5]  }
   0x7   :  { %s28_s29 = sshll.u32 %s423_s1, 4  ;;  %s328_s30 = smov [#allocation6]   ;;  %s29_s29 = int_to_ptr.hbm [resolvable:$true] %s28_s29 }
   0x8   :  { %s30_s2 = sshll.u32 %s328_s30, 4  ;;  %s52_s8 = sshll.u32 %s426_s4, 4  ;;  %s31_s2 = int_to_ptr.vmem [resolvable:$true] %s30_s2  ;;  %s53_s8 = int_to_ptr.hbm [resolvable:$true] %s52_s8 }
   0x9   :  { %33 = dma.hbm_to_vmem [thread:$0]  %s29_s29, 32, %s31_s2, [#allocation3]  }
   0xa   :  { %s329_s9 = smov [#allocation9]  }
   0xb   :  { %s54_s0 = sshll.u32 %s329_s9, 4  ;;  %s55_s0 = int_to_ptr.vmem [resolvable:$true] %s54_s0 }
   0xc   :  { %57 = dma.hbm_to_vmem [thread:$0]  %s53_s8, 32, %s55_s0, [#allocation8]  }
   0xd   :  { %318 = dma.done.wait [#allocation5], 16  }
   0xe   :  { %319 = vsyncadd [#allocation5], 4294967280 }
   0xf   :  { %320 = dma.done.wait [#allocation3], 32  }
  0x10   :  { %321 = vsyncadd [#allocation3], 4294967264 }
  0x11   :  { %322 = dma.done.wait [#allocation8], 64  }
  0x12   :  { %323 = vsyncadd [#allocation8], 4294967232 }
  0x13   :  { %74 = sfence }
  0x14   :  { %s75_s1 = sld [smem:[#allocation2]]  ;;  %v76_v0 = vld [vmem:[#allocation6] sm:$0x3]  ;;  %v97_v1 = vld [vmem:[#allocation7] sm:$0x3]  ;;  %vm159_vm1 = vcmask 91136  }
  0x15   :  { %s192_s10 = sld [smem:[#allocation2 + $0x1]]  ;;  %v118_v3 = vld [vmem:[%s425_s3] sm:$0x3]  ;;  %v139_v6 = vld [vmem:[#allocation9] sm:$0x3]  ;;  %s330_s3 = smov [#allocation10]  }
  0x16   :  { %s193_s11 = sld [smem:[#allocation2 + $0x2]]  ;;  %s175_s14 = sshll.u32 %s330_s3, 4  ;;  %s176_s14 = int_to_ptr.vmem [resolvable:$true] %s175_s14 }
  0x17   :  { %s194_s12 = sld [smem:[#allocation2 + $0x3]]  ;;  %s177_s17 = sshll.u32 %s427_s5, 4  ;;  %s178_s17 = int_to_ptr.hbm [resolvable:$true] %s177_s17 }
  0x18   :  { %s331_s5 = smov 32   ;;  %s332_s18 = smov 2  }
  0x1a   :  { %v77_v2 = vstv %s75_s1 }
  0x1b   :  { %v78_v4 = vsub.f32 %v76_v0, %v77_v2  ;;  %v98_v5 = vstv %s192_s10 }
  0x1c   :  { %v99_v7 = vsub.f32 %v97_v1, %v98_v5  ;;  %v119_v8 = vstv %s193_s11 }
  0x1d   :  { %v79_v9 = vand.u32 2147483647, %v78_v4  ;;  %v120_v10 = vsub.f32 %v118_v3, %v119_v8  ;;  %v140_v11 = vstv %s194_s12 }
  0x1e   :  { %v100_v12 = vand.u32 2147483647, %v99_v7  ;;  %v141_v13 = vsub.f32 %v139_v6, %v140_v11 }
  0x1f   :  { %v80_v14 = vadd.f32 0.001, %v79_v9  ;;  %v121_v15 = vand.u32 2147483647, %v120_v10 }
  0x20   :  { %v101_v16 = vadd.f32 0.001, %v100_v12  ;;  %v142_v17 = vand.u32 2147483647, %v141_v13 }
  0x21   :  { %202 = vrcp.f32 %v80_v14  ;;  %v122_v18 = vadd.f32 0.001, %v121_v15  ;;  %v90_v20 = vand.u32 2147483647, %v80_v14  ;;  %v92_v21 = vand.u32 2147483648, %v80_v14 }
  0x22   :  { %204 = vrcp.f32 %v101_v16  ;;  %v143_v19 = vadd.f32 0.001, %v142_v17  ;;  %v111_v23 = vand.u32 2147483647, %v101_v16  ;;  %v113_v24 = vand.u32 2147483648, %v101_v16 }
  0x23   :  { %206 = vrcp.f32 %v122_v18  ;;  %vm86_vm0 = vweird.f32 %v80_v14  ;;  %vm107_vm2 = vweird.f32 %v101_v16  ;;  %vm378_vm4 = vcmp.eq.f32.partialorder %v90_v20, 8.507059e+37 }
  0x24   :  { %208 = vrcp.f32 %v143_v19  ;;  %v93_v30 = vor.u32 1.1754944e-38, %v92_v21  ;;  %vm382_vm6 = vcmp.eq.f32.partialorder %v111_v23, 8.507059e+37  ;;  %v114_v34 = vor.u32 1.1754944e-38, %v113_v24 }
  0x25   :  { %vm128_vm7 = vweird.f32 %v122_v18  ;;  %v132_v38 = vand.u32 2147483647, %v122_v18  ;;  %v134_v41 = vand.u32 2147483648, %v122_v18  ;;  %vm149_vm9 = vweird.f32 %v143_v19 }
  0x26   :  { %v155_v46 = vand.u32 2147483648, %v143_v19  ;;  %v153_v49 = vand.u32 2147483647, %v143_v19 }
  0x27   :  { %v203_v22 = vpop.eup %202  ;;  %v135_v55 = vor.u32 1.1754944e-38, %v134_v41  ;;  %vm133_vm14 = vcmp.eq.f32.partialorder %v132_v38, 8.507059e+37 }
  0x28   :  { %v205_v25 = vpop.eup %204  ;;  %v82_v26 = vmul.f32 %v203_v22, %v80_v14  ;;  %vm87_vm3 = vweird.f32 %v203_v22  ;;  %v156_v59 = vor.u32 1.1754944e-38, %v155_v46 }
  0x29   :  { %v103_v27 = vmul.f32 %v205_v25, %v101_v16  ;;  %v207_v31 = vpop.eup %206  ;;  %vm108_vm5 = vweird.f32 %v205_v25  ;;  %vm387_vm8 = vmor %vm86_vm0, %vm87_vm3  ;;  %vm154_vm0 = vcmp.eq.f32.partialorder %v153_v49, 8.507059e+37 }
  0x2a   :  { %v83_v28 = vsub.f32 1.0, %v82_v26  ;;  %v209_v35 = vpop.eup %208  ;;  %v124_v37 = vmul.f32 %v207_v31, %v122_v18  ;;  %vm392_vm10 = vmor %vm107_vm2, %vm108_vm5  ;;  %vm129_vm11 = vweird.f32 %v207_v31 }
  0x2b   :  { %v104_v32 = vsub.f32 1.0, %v103_v27  ;;  %v145_v42 = vmul.f32 %v209_v35, %v143_v19  ;;  %vm150_vm12 = vweird.f32 %v209_v35  ;;  %vm403_vm13 = vmor %vm128_vm7, %vm129_vm11 }
  0x2c   :  { %v84_v36 = vmul.f32 %v203_v22, %v83_v28  ;;  %v125_v45 = vsub.f32 1.0, %v124_v37  ;;  %vm151_vm15 = vmor %vm149_vm9, %vm150_vm12 }
  0x2d   :  { %v105_v40 = vmul.f32 %v205_v25, %v104_v32  ;;  %v146_v48 = vsub.f32 1.0, %v145_v42 }
  0x2e   :  { %v85_v43 = vadd.f32 %v203_v22, %v84_v36  ;;  %v126_v51 = vmul.f32 %v207_v31, %v125_v45 }
  0x2f   :  { %v106_v47 = vadd.f32 %v205_v25, %v105_v40  ;;  %v147_v56 = vmul.f32 %v209_v35, %v146_v48 }
  0x30   :  { %v89_v50 = vsel %vm387_vm8, %v203_v22, %v85_v43  ;;  %v127_v58 = vadd.f32 %v207_v31, %v126_v51 }
  0x31   :  { %v94_v52 = vsel %vm378_vm4, %v93_v30, %v89_v50  ;;  %v110_v53 = vsel %vm392_vm10, %v205_v25, %v106_v47  ;;  %v148_v60 = vadd.f32 %v209_v35, %v147_v56 }
  0x32   :  { %160 = vst.msk [vmem:[#allocation10] sm:$0x3] %vm159_vm1, %v94_v52  ;;  %v115_v57 = vsel %vm382_vm6, %v114_v34, %v110_v53  ;;  %v131_v61 = vsel %vm403_vm13, %v207_v31, %v127_v58 }
  0x33   :  { %164 = vst.msk [vmem:[#allocation10 + $0x4] sm:$0x3] %vm159_vm1, %v94_v52  ;;  %v136_v62 = vsel %vm133_vm14, %v135_v55, %v131_v61  ;;  %v152_v63 = vsel %vm151_vm15, %v209_v35, %v148_v60 }
  0x34   :  { %162 = vst.msk [vmem:[#allocation10 + $0x2] sm:$0x3] %vm159_vm1, %v115_v57  ;;  %v157_v0 = vsel %vm154_vm0, %v156_v59, %v152_v63 }
  0x35   :  { %166 = vst.msk [vmem:[#allocation10 + $0x6] sm:$0x3] %vm159_vm1, %v115_v57 }
  0x36   :  { %168 = vst.msk [vmem:[#allocation10 + $0x8] sm:$0x3] %vm159_vm1, %v136_v62 }
  0x37   :  { %170 = vst.msk [vmem:[#allocation10 + $0xa] sm:$0x3] %vm159_vm1, %v157_v0 }
  0x38   :  { %183 = dma.vmem_to_hbm [thread:$0]  %s176_s14, 192, %s178_s17, [#allocation4], %s331_s5, %s331_s5, %s332_s18  }
  0x39   :  { %324 = dma.done.wait [#allocation4], 192  }
  0x3a   :  { %325 = vsyncadd [#allocation4], 4294967104 }
  0x3b   :  { %188 = vsyncpa [#allocation3], 1 }
  0x3c   :  { %189 = vsyncpa [#allocation8], 1 }
  0x3d   :  { %190 = vsyncpa [#allocation4], 1 }
  0x3e   :  { %191 = vsyncpa [#allocation5], 1 }

</bundles_post_ra>
